<compile_context>
chip_gen: v6e
topology: v6e:2x2x1
jax: 0.10.0
libtpu: 0.0.40
codegen_flags: <defaults>
</compile_context>

<pallas_src>
import functools

import jax
import jax.numpy as jnp
import numpy as np
from jax.experimental import pallas as pl
from jax.experimental.pallas import tpu as pltpu

_LANES = 128
_ZF_BLOCK_BUDGET = 8 * 1024 * 1024     # target bytes of z_f per grid step
_VMEM_CEIL = 48 * 1024 * 1024          # stay under v7x's 64 MiB physical VMEM
_PAD_VALUE = 1.0e6                     # padded anchors -> dist >> hinge -> 0


def _round_up(x, m):
    return ((x + m - 1) // m) * m


def _neg_loss_kernel(hinge, n_neg, d_model, chunk, n_chunks,
                     z_n_ref, z_f_ref, out_ref, acc_ref):
    """Hinged negative-loss partial sums.

    Grid = (n_steps,): each step owns `bm` anchors.  z_f arrives as one big
    contiguous lane-dense (bm, n_neg*D) block; we loop over `chunk`-anchor
    sub-chunks and, per chunk, over the n_neg statically-unrolled lane
    segments, pairing segment j of anchor i with z_n row i — torch's tile()
    is never materialized.
    """
    step = pl.program_id(0)

    @pl.when(step == 0)
    def _init():
        acc_ref[...] = jnp.zeros_like(acc_ref)

    @pl.loop(0, n_chunks)
    def _per_chunk(c):
        a0 = pl.multiple_of(c * chunk, chunk)
        z_n_c = z_n_ref[pl.ds(a0, chunk), :].astype(jnp.float32)       # (chunk, D)
        hinged = jnp.zeros((chunk, 1), jnp.float32)
        for j in range(n_neg):                                         # static unroll
            z_f_cj = z_f_ref[pl.ds(a0, chunk), pl.ds(j * d_model, d_model)]
            diff = z_f_cj.astype(jnp.float32) - z_n_c
            # TODO(synk): on v6e/v7x this lane-axis reduce can bind the XLU;
            # offload it to the idle MXU ((diff*diff) @ ones((D,1))) once f32
            # matmul precision under Mosaic is confirmed exact (HIGHEST).
            dist = 0.5 * jnp.sum(diff * diff, axis=1, keepdims=True)   # (chunk, 1)
            hinged = hinged + jnp.maximum(0.0, hinge - dist)
        acc_ref[...] += hinged

    @pl.when(step == pl.num_programs(0) - 1)
    def _finalize():
        out_ref[...] = jnp.broadcast_to(jnp.sum(acc_ref[...]), out_ref.shape)


def _negative_loss_sum(z_n, z_f, n_neg, hinge):
    """sum_{i,j} max(0, hinge - 0.5*||z_f[i*n_neg+j] - z_n[i]||^2) via Pallas."""
    B, D = z_n.shape
    itemsize = jnp.dtype(z_f.dtype).itemsize
    width = n_neg * D

    # Free (row-major) reshape: anchor i's n_neg negatives become one
    # contiguous lane-dense row of length n_neg*D.
    z_f2 = jnp.reshape(z_f, (B, width))

    # --- tile sizing -------------------------------------------------------
    # chunk: anchors per inner compute chunk; keeps each (chunk, r128(D)) f32
    # temporary at <= 8 vregs so the unrolled j-loop avoids spills.
    d_pad = _round_up(D, _LANES)
    chunk = max(8, min(128, ((8192 // d_pad) // 8) * 8))
    chunk = min(chunk, _round_up(B, 8))

    # bm: anchors per grid step, sized from the ~8 MiB z_f-block budget so the
    # fixed ~0.35 us per-step cost is amortized and the DMA stays contiguous.
    row_bytes = _round_up(width, _LANES) * itemsize
    bm_cap = max(chunk, (_ZF_BLOCK_BUDGET // max(row_bytes, 1)) // chunk * chunk)
    n_steps = -(-B // bm_cap)
    bm = _round_up(-(-B // n_steps), chunk)
    b_pad = n_steps * bm
    n_chunks = bm // chunk

    if b_pad != B:
        pad = b_pad - B
        # Padded anchors get a huge embedding (and zero negatives) so that
        # hinge - dist << 0 -> contribution exactly 0; no per-step mask needed.
        z_n_p = jnp.pad(z_n, ((0, pad), (0, 0)), constant_values=_PAD_VALUE)
        z_f_p = jnp.pad(z_f2, ((0, pad), (0, 0)))
    else:
        z_n_p, z_f_p = z_n, z_f2

    # Note: hinge / shapes are baked into the kernel -> changing hinge or the
    # batch layout recompiles (acceptable for a fixed training config).
    kernel = functools.partial(_neg_loss_kernel, float(hinge), n_neg, D, chunk,
                               n_chunks)

    zf_block_bytes = bm * row_bytes
    zn_block_bytes = bm * _round_up(D, _LANES) * itemsize
    vmem_limit = int(min(_VMEM_CEIL,
                         max(32 * 1024 * 1024,
                             2 * (zf_block_bytes + zn_block_bytes) + (1 << 20))))

    cost = pl.CostEstimate(
        flops=int(b_pad) * n_neg * (3 * D + 4),
        transcendentals=0,
        bytes_accessed=int(z_f_p.size) * itemsize + int(z_n_p.size) * itemsize
        + _LANES * 4)

    # TODO(synk): on v7x (2 TensorCores) shard the grid with CORE_PARALLEL /
    # pl.core_map and one partial-sum row per core; single-TC v5e/v6e keep the
    # simple 1-D accumulating grid below.
    out = pl.pallas_call(
        kernel,
        grid=(n_steps,),
        in_specs=[
            pl.BlockSpec((bm, D), lambda s: (s, 0)),       # z_n (anchors)
            pl.BlockSpec((bm, width), lambda s: (s, 0)),   # z_f (lane-dense rows)
        ],
        out_specs=pl.BlockSpec((1, _LANES), lambda s: (0, 0)),
        out_shape=jax.ShapeDtypeStruct((1, _LANES), jnp.float32),
        scratch_shapes=[pltpu.VMEM((chunk, 1), jnp.float32)],
        compiler_params=pltpu.CompilerParams(
            dimension_semantics=("arbitrary",),
            vmem_limit_bytes=vmem_limit),
        cost_estimate=cost,
    )(z_n_p, z_f_p)
    return out[0, 0]


def loss_forward(z_c, z_l, z_n, z_f, r, r_e, *, hinge=1.0, neg=True, rew=True):
    """JAX/Pallas equivalent of Loss(hinge, neg, rew).forward(...)."""
    B, D = z_n.shape
    assert z_l.shape == (B, D)
    assert z_f.shape[0] % B == 0 and z_f.shape[1] == D
    n_neg = z_f.shape[0] // B

    # Transition & reward are tiny O(B*D)/O(B) fused element-wise reductions:
    # computed with plain jnp per the perf review; Pallas handles the dominant
    # negative-loss stream over z_f (B*n_neg*D elements).
    z_n32 = z_n.astype(jnp.float32)
    z_l32 = z_l.astype(jnp.float32)
    transition_loss = jnp.mean(0.5 * jnp.sum((z_n32 - z_l32) ** 2, axis=1))

    zero = jnp.zeros((), jnp.float32)
    if rew:
        r2 = jnp.reshape(r, (r.shape[0], -1)).astype(jnp.float32)
        re2 = jnp.reshape(r_e, (r_e.shape[0], -1)).astype(jnp.float32)
        reward_loss = 0.5 * jnp.mean(jnp.sum((r2 - re2) ** 2, axis=1))
    else:
        reward_loss = zero

    if neg:
        negative_loss = _negative_loss_sum(z_n, z_f, n_neg, hinge) / z_c.shape[0]
    else:
        negative_loss = zero

    return transition_loss, reward_loss, negative_loss


def loss_reference(z_c, z_l, z_n, z_f, r, r_e, *, hinge=1.0):
    """Pure-JAX reference mirroring the PyTorch semantics."""
    z_l32 = z_l.astype(jnp.float32)
    z_n32 = z_n.astype(jnp.float32)
    z_f32 = z_f.astype(jnp.float32)
    n_rep = z_f.shape[0] // z_n.shape[0]
    transition = jnp.mean(0.5 * jnp.sum((z_n32 - z_l32) ** 2, axis=1))
    r2 = jnp.reshape(r, (r.shape[0], -1)).astype(jnp.float32)
    re2 = jnp.reshape(r_e, (r_e.shape[0], -1)).astype(jnp.float32)
    reward = 0.5 * jnp.mean(jnp.sum((r2 - re2) ** 2, axis=1))
    z_nt = jnp.repeat(z_n32, n_rep, axis=0)       # == torch tile() grouping
    dist = 0.5 * jnp.sum((z_nt - z_f32) ** 2, axis=1)
    negative = jnp.sum(jnp.maximum(0.0, hinge - dist)) / z_c.shape[0]
    return transition, reward, negative


if __name__ == "__main__":
    # hinge ~ typical squared distance so the hinge term is non-trivial.
    HINGE = 40.0

    def make_inputs(key, B, D, n_neg, dtype):
        ks = jax.random.split(key, 6)
        z_c = jax.random.normal(ks[0], (B, D), dtype=dtype)           # current embedding
        z_l = jax.random.normal(ks[1], (B, D), dtype=dtype)           # transition target
        z_n = jax.random.normal(ks[2], (B, D), dtype=dtype)           # next-state embedding
        z_f = jax.random.normal(ks[3], (B * n_neg, D), dtype=dtype)   # negatives
        r = jax.random.normal(ks[4], (B, 1), dtype=dtype)             # predicted reward
        r_e = jax.random.normal(ks[5], (B, 1), dtype=dtype)           # env reward
        return z_c, z_l, z_n, z_f, r, r_e

    # Case 1: aligned batch, float32.
    args = make_inputs(jax.random.PRNGKey(0), 8, 32, 4, jnp.float32)
    out = jax.block_until_ready(loss_forward(*args, hinge=HINGE, neg=True, rew=True))
    ref = loss_reference(*args, hinge=HINGE)
    for got, want in zip(out, ref):
        np.testing.assert_allclose(np.asarray(got), np.asarray(want),
                                   rtol=1e-5, atol=1e-5)

    # Case 2: batch not a multiple of 8 (exercises padded anchors with the
    # large-constant trick) and bf16 inputs (exercises in-kernel upcast).
    args = make_inputs(jax.random.PRNGKey(0), 6, 32, 3, jnp.bfloat16)
    out = jax.block_until_ready(loss_forward(*args, hinge=HINGE, neg=True, rew=True))
    ref = loss_reference(*args, hinge=HINGE)
    for got, want in zip(out, ref):
        np.testing.assert_allclose(np.asarray(got), np.asarray(want),
                                   rtol=2e-2, atol=2e-2)

    print("KERNEL_OK")
</pallas_src>

<mosaic_0001>
module attributes {stable_mosaic.version = 11 : i64} {
  func.func @_neg_loss_kernel(%arg0: i32, %arg1: memref<8x32xf32, #tpu.memory_space<vmem>>, %arg2: memref<8x128xf32, #tpu.memory_space<vmem>>, %arg3: memref<1x128xf32, #tpu.memory_space<vmem>>, %arg4: memref<8x1xf32, #tpu.memory_space<vmem>>) attributes {dimension_semantics = [#tpu.dimension_semantics<arbitrary>], iteration_bounds = array<i64: 1>, scalar_prefetch = 0 : i64, scratch_operands = 1 : i64, tpu.core_type = #tpu.core_type<tc>, window_params = [{transform_indices = @transform_0, window_bounds = array<i64: 8, 32>}, {transform_indices = @transform_1, window_bounds = array<i64: 8, 128>}, {pipeline_mode = #tpu.pipeline_mode<synchronous>, transform_indices = @transform_2, window_bounds = array<i64: 1, 128>}]} {
    %c0_i32 = arith.constant 0 : i32
    %0 = arith.cmpi eq, %arg0, %c0_i32 : i32
    %1 = arith.extui %0 : i1 to i32
    %c0_i32_0 = arith.constant 0 : i32
    %2 = arith.cmpi ne, %1, %c0_i32_0 : i32
    scf.if %2 {
      %cst_27 = arith.constant 0.000000e+00 : f32
      %68 = vector.broadcast %cst_27 : f32 to vector<8x1xf32>
      %c0_28 = arith.constant 0 : index
      %c0_29 = arith.constant 0 : index
      %69 = vector.load %arg4[%c0_28, %c0_29] : memref<8x1xf32, #tpu.memory_space<vmem>>, vector<8x1xf32>
      tpu.vector_store %arg4[%c0_28, %c0_29], %68 {strides = array<i32>} : memref<8x1xf32, #tpu.memory_space<vmem>>, vector<8x1xf32>,
    } else {
    }
    %c0_i32_1 = arith.constant 0 : i32
    %c1_i32 = arith.constant 1 : i32
    %3 = arith.muli %c0_i32_1, %c1_i32 : i32
    %c0_i32_2 = arith.constant 0 : i32
    %4 = arith.addi %c0_i32_2, %3 : i32
    %c8_i32 = arith.constant 8 : i32
    %5 = arith.muli %4, %c8_i32 : i32
    %6 = tpu.assume_multiple %5, 8 : i32
    %7 = arith.index_cast %6 : i32 to index
    %c0 = arith.constant 0 : index
    %8 = vector.load %arg1[%7, %c0] : memref<8x32xf32, #tpu.memory_space<vmem>>, vector<8x32xf32>
    %cst = arith.constant 0.000000e+00 : f32
    %9 = vector.broadcast %cst : f32 to vector<8x1xf32>
    %10 = arith.index_cast %6 : i32 to index
    %c0_3 = arith.constant 0 : index
    %11 = vector.load %arg2[%10, %c0_3] : memref<8x128xf32, #tpu.memory_space<vmem>>, vector<8x32xf32>
    %12 = arith.subf %11, %8 : vector<8x32xf32>
    %13 = arith.mulf %12, %12 : vector<8x32xf32>
    %cst_4 = arith.constant dense<0.000000e+00> : vector<8xf32>
    %14 = vector.multi_reduction <add>, %13, %cst_4 [1] : vector<8x32xf32> to vector<8xf32>
    %15 = vector.shape_cast %14 : vector<8xf32> to vector<8x1xf32>
    %cst_5 = arith.constant 5.000000e-01 : f32
    %16 = vector.broadcast %cst_5 : f32 to vector<8x1xf32>
    %17 = arith.mulf %16, %15 : vector<8x1xf32>
    %cst_6 = arith.constant 4.000000e+01 : f32
    %18 = vector.broadcast %cst_6 : f32 to vector<8x1xf32>
    %19 = arith.subf %18, %17 : vector<8x1xf32>
    %cst_7 = arith.constant 0.000000e+00 : f32
    %20 = vector.broadcast %cst_7 : f32 to vector<8x1xf32>
    %21 = arith.maximumf %20, %19 : vector<8x1xf32>
    %22 = arith.addf %9, %21 : vector<8x1xf32>
    %23 = arith.index_cast %6 : i32 to index
    %c32 = arith.constant 32 : index
    %24 = vector.load %arg2[%23, %c32] : memref<8x128xf32, #tpu.memory_space<vmem>>, vector<8x32xf32>
    %25 = arith.subf %24, %8 : vector<8x32xf32>
    %26 = arith.mulf %25, %25 : vector<8x32xf32>
    %cst_8 = arith.constant dense<0.000000e+00> : vector<8xf32>
    %27 = vector.multi_reduction <add>, %26, %cst_8 [1] : vector<8x32xf32> to vector<8xf32>
    %28 = vector.shape_cast %27 : vector<8xf32> to vector<8x1xf32>
    %cst_9 = arith.constant 5.000000e-01 : f32
    %29 = vector.broadcast %cst_9 : f32 to vector<8x1xf32>
    %30 = arith.mulf %29, %28 : vector<8x1xf32>
    %cst_10 = arith.constant 4.000000e+01 : f32
    %31 = vector.broadcast %cst_10 : f32 to vector<8x1xf32>
    %32 = arith.subf %31, %30 : vector<8x1xf32>
    %cst_11 = arith.constant 0.000000e+00 : f32
    %33 = vector.broadcast %cst_11 : f32 to vector<8x1xf32>
    %34 = arith.maximumf %33, %32 : vector<8x1xf32>
    %35 = arith.addf %22, %34 : vector<8x1xf32>
    %36 = arith.index_cast %6 : i32 to index
    %c64 = arith.constant 64 : index
    %37 = vector.load %arg2[%36, %c64] : memref<8x128xf32, #tpu.memory_space<vmem>>, vector<8x32xf32>
    %38 = arith.subf %37, %8 : vector<8x32xf32>
    %39 = arith.mulf %38, %38 : vector<8x32xf32>
    %cst_12 = arith.constant dense<0.000000e+00> : vector<8xf32>
    %40 = vector.multi_reduction <add>, %39, %cst_12 [1] : vector<8x32xf32> to vector<8xf32>
    %41 = vector.shape_cast %40 : vector<8xf32> to vector<8x1xf32>
    %cst_13 = arith.constant 5.000000e-01 : f32
    %42 = vector.broadcast %cst_13 : f32 to vector<8x1xf32>
    %43 = arith.mulf %42, %41 : vector<8x1xf32>
    %cst_14 = arith.constant 4.000000e+01 : f32
    %44 = vector.broadcast %cst_14 : f32 to vector<8x1xf32>
    %45 = arith.subf %44, %43 : vector<8x1xf32>
    %cst_15 = arith.constant 0.000000e+00 : f32
    %46 = vector.broadcast %cst_15 : f32 to vector<8x1xf32>
    %47 = arith.maximumf %46, %45 : vector<8x1xf32>
    %48 = arith.addf %35, %47 : vector<8x1xf32>
    %49 = arith.index_cast %6 : i32 to index
    %c96 = arith.constant 96 : index
    %50 = vector.load %arg2[%49, %c96] : memref<8x128xf32, #tpu.memory_space<vmem>>, vector<8x32xf32>
    %51 = arith.subf %50, %8 : vector<8x32xf32>
    %52 = arith.mulf %51, %51 : vector<8x32xf32>
    %cst_16 = arith.constant dense<0.000000e+00> : vector<8xf32>
    %53 = vector.multi_reduction <add>, %52, %cst_16 [1] : vector<8x32xf32> to vector<8xf32>
    %54 = vector.shape_cast %53 : vector<8xf32> to vector<8x1xf32>
    %cst_17 = arith.constant 5.000000e-01 : f32
    %55 = vector.broadcast %cst_17 : f32 to vector<8x1xf32>
    %56 = arith.mulf %55, %54 : vector<8x1xf32>
    %cst_18 = arith.constant 4.000000e+01 : f32
    %57 = vector.broadcast %cst_18 : f32 to vector<8x1xf32>
    %58 = arith.subf %57, %56 : vector<8x1xf32>
    %cst_19 = arith.constant 0.000000e+00 : f32
    %59 = vector.broadcast %cst_19 : f32 to vector<8x1xf32>
    %60 = arith.maximumf %59, %58 : vector<8x1xf32>
    %61 = arith.addf %48, %60 : vector<8x1xf32>
    %c0_20 = arith.constant 0 : index
    %c0_21 = arith.constant 0 : index
    %62 = vector.load %arg4[%c0_20, %c0_21] : memref<8x1xf32, #tpu.memory_space<vmem>>, vector<8x1xf32>
    %63 = arith.addf %62, %61 : vector<8x1xf32>
    %c0_22 = arith.constant 0 : index
    %c0_23 = arith.constant 0 : index
    %64 = vector.load %arg4[%c0_22, %c0_23] : memref<8x1xf32, #tpu.memory_space<vmem>>, vector<8x1xf32>
    tpu.vector_store %arg4[%c0_22, %c0_23], %63 {strides = array<i32>} : memref<8x1xf32, #tpu.memory_space<vmem>>, vector<8x1xf32>,
    %c1_i32_24 = arith.constant 1 : i32
    %c0_i32_25 = arith.constant 0 : i32
    %65 = arith.cmpi eq, %arg0, %c0_i32_25 : i32
    %66 = arith.extui %65 : i1 to i32
    %c0_i32_26 = arith.constant 0 : i32
    %67 = arith.cmpi ne, %66, %c0_i32_26 : i32
    scf.if %67 {
      %c0_27 = arith.constant 0 : index
      %c0_28 = arith.constant 0 : index
      %68 = vector.load %arg4[%c0_27, %c0_28] : memref<8x1xf32, #tpu.memory_space<vmem>>, vector<8x1xf32>
      %69 = vector.shape_cast %68 : vector<8x1xf32> to vector<1x8x1xf32>
      %cst_29 = arith.constant dense<0.000000e+00> : vector<1xf32>
      %70 = vector.multi_reduction <add>, %69, %cst_29 [1, 2] : vector<1x8x1xf32> to vector<1xf32>
      %71 = vector.shape_cast %70 : vector<1xf32> to vector<1x1x1xf32>
      %72 = vector.extract %71[0, 0, 0] : f32 from vector<1x1x1xf32>
      %73 = vector.broadcast %72 : f32 to vector<1x128xf32>
      %c0_30 = arith.constant 0 : index
      %c0_31 = arith.constant 0 : index
      %74 = vector.load %arg3[%c0_30, %c0_31] : memref<1x128xf32, #tpu.memory_space<vmem>>, vector<1x128xf32>
      tpu.vector_store %arg3[%c0_30, %c0_31], %73 {strides = array<i32>} : memref<1x128xf32, #tpu.memory_space<vmem>>, vector<1x128xf32>,
    } else {
    }
    return
  }
  func.func @transform_0(%arg0: i32) -> (i32, i32) {
    %c0_i32 = arith.constant 0 : i32
    %c0_i32_0 = arith.constant 0 : i32
    return %arg0, %c0_i32 : i32, i32
  }
  func.func @transform_1(%arg0: i32) -> (i32, i32) {
    %c0_i32 = arith.constant 0 : i32
    %c0_i32_0 = arith.constant 0 : i32
    return %arg0, %c0_i32 : i32, i32
  }
  func.func @transform_2(%arg0: i32) -> (i32, i32) {
    %c0_i32 = arith.constant 0 : i32
    %c0_i32_0 = arith.constant 0 : i32
    %c0_i32_1 = arith.constant 0 : i32
    return %c0_i32, %c0_i32_0 : i32, i32
  }
}

</mosaic_0001>

<bundles_post_ra>
// kernel: tpu_custom_call.1
= control target key start
LH: loop header
LB: loop body
LE: loop exit
PB: predicated region body
PF: predicated region fallthrough
CT: control target
= control target key end

     0   :  { %7 = vsyncpa [#allocation4], 0  ;;  %s248_s0 = inlined_call_operand.hbm [shape: f32[8,32], index: 0, kind: input, shape index: {}]   ;;  %s249_s1 = inlined_call_operand.hbm [shape: f32[8,128], index: 1, kind: input, shape index: {}]   ;;  %s250_s2 = inlined_call_operand.hbm [shape: f32[1,128], index: 2, kind: output, shape index: {}]  }
   0x1   :  { %8 = vsyncpa [#allocation7], 0 }
   0x2   :  { %9 = vsyncpa [#allocation5], 0  ;;  %s214_s9 = smov [#allocation3]   ;;  %s215_s11 = smov [#allocation6]  }
   0x3   :  { %s16_s10 = sshll.u32 %s214_s9, 4  ;;  %s26_s12 = sshll.u32 %s215_s11, 4  ;;  %s17_s10 = int_to_ptr.vmem [resolvable:$true] %s16_s10  ;;  %s27_s12 = int_to_ptr.vmem [resolvable:$true] %s26_s12 }
   0x4   :  { %s156_s13 = scalar_lea.vmem %s17_s10, 128  ;;  %p161_p1 = scmp.lt.s32.totalorder %s17_s10, %s17_s10 }
   0x5   :  { %p157_p0 = scmp.ne.s32.totalorder %s17_s10, %s156_s13  ;;  %p162_p2 = scmp.lt.s32.totalorder %s156_s13, %s156_s13 }
   0x7   :  { %p163_p3 = por %p162_p2, %p161_p1 }
   0x9   :  { %p164_p4 = pnand %p163_p3, %p157_p0 }
   0xb   :  { %167 = shalt.err (!%p164_p4)
}
   0xc   :  { %19 = dma.hbm_to_vmem [thread:$0]  %s248_s0, 128, %s17_s10, [#allocation4]  }
   0xd   :  { %s176_s16 = scalar_lea.vmem %s27_s12, 128  ;;  %p181_p6 = scmp.lt.s32.totalorder %s27_s12, %s27_s12 }
   0xe   :  { %p177_p5 = scmp.ne.s32.totalorder %s27_s12, %s176_s16  ;;  %p182_p7 = scmp.lt.s32.totalorder %s176_s16, %s176_s16 }
  0x10   :  { %p183_p8 = por %p182_p7, %p181_p6 }
  0x12   :  { %p184_p9 = pnand %p183_p8, %p177_p5 }
  0x14   :  { %187 = shalt.err (!%p184_p9)
}
  0x15   :  { %29 = dma.hbm_to_vmem [thread:$0]  %s249_s1, 128, %s27_s12, [#allocation7]  }
  0x16   :  { %208 = dma.done.wait [#allocation4], 128  }
  0x17   :  { %209 = vsyncadd [#allocation4], 4294967168 }
  0x18   :  { %210 = dma.done.wait [#allocation7], 128  }
  0x19   :  { %211 = vsyncadd [#allocation7], 4294967168  ;;  %v42_v0 = vld [vmem:[#allocation3] sm:$0xff]  ;;  %s216_s19 = smov 32   ;;  %s217_s20 = smov 96   ;;  %v43_v1 = vld [vmem:[#allocation6] sm:$0xff] }
  0x1a   :  { %55 = vrot.lane.b32.xlu0 %v42_v0, %s216_s19  ;;  %87 = vrot.lane.b32.xlu1 %v42_v0, %s217_s20  ;;  %s218_s0 = smov 64   ;;  %v44_v11 = vsub.f32 %v43_v1, %v42_v0  ;;  %vm46_vm0 = vcmask 261120   ;;  %vm40_vm1 = vcmask 7168   ;;  %v219_v20 = vmov 0.0   ;;  %s220_s1 = smov [#allocation8]  }
  0x1b   :  { %41 = vst.msk [vmem:[#allocation2] sm:$0xff] %vm40_vm1, %v219_v20  ;;  %s129_s21 = sshll.u32 %s220_s1, 4  ;;  %s130_s21 = int_to_ptr.vmem [resolvable:$true] %s129_s21 }
  0x1c   :  { %v45_v12 = vmul.f32 %v44_v11, %v44_v11  ;;  %s188_s23 = scalar_lea.vmem %s130_s21, 16  ;;  %s192_s24 = scalar_lea.vmem %s130_s21, 32 }
  0x1d   :  { %p189_p10 = scmp.ne.s32.totalorder %s130_s21, %s188_s23  ;;  %p193_p11 = scmp.lt.s32.totalorder %s130_s21, %s130_s21 }
  0x1e   :  { %71 = vrot.lane.b32.xlu0 %v42_v0, %s218_s0  ;;  %v47_v13 = vsel %vm46_vm0, %v45_v12, 0.0  ;;  %p194_p12 = scmp.lt.s32.totalorder %s192_s24, %s188_s23 }
  0x20   :  { %p195_p13 = por %p194_p12, %p193_p11 }
  0x22   :  { %v103_v39 = vld [vmem:[#allocation2] sm:$0xff]  ;;  %p196_p0 = pnand %p195_p13, %p189_p10 }
  0x8c   :  { %v56_v2 = vpop.permute.xlu0 %55  ;;  %v88_v3 = vpop.permute.xlu1 %87 }
  0x8d   :  { %v58_v4 = vsub.f32 %v43_v1, %v56_v2  ;;  %v90_v5 = vsub.f32 %v43_v1, %v88_v3 }
  0x8f   :  { %v59_v6 = vmul.f32 %v58_v4, %v58_v4  ;;  %v91_v9 = vmul.f32 %v90_v5, %v90_v5 }
  0x90   :  { %v72_v7 = vpop.permute.xlu0 %71 }
  0x91   :  { %v74_v8 = vsub.f32 %v43_v1, %v72_v7  ;;  %61 = vrot.lane.b32.xlu1 %v59_v6, %s217_s20 }
  0x93   :  { %v75_v10 = vmul.f32 %v74_v8, %v74_v8 }
  0x95   :  { %77 = vrot.lane.b32.xlu0 %v75_v10, %s218_s0  ;;  %93 = vrot.lane.b32.xlu1 %v91_v9, %s216_s19 }
  0xb4   :  { %48 = vadd.xlane.f32.xlu0 %v47_v13 }
 0x103   :  { %v62_v14 = vpop.permute.xlu1 %61 }
 0x104   :  { %v64_v15 = vsel %vm46_vm0, %v62_v14, 0.0 }
 0x105   :  { %65 = vadd.xlane.f32.xlu1 %v64_v15 }
 0x107   :  { %v78_v16 = vpop.permute.xlu0 %77  ;;  %v94_v17 = vpop.permute.xlu1 %93 }
 0x108   :  { %v80_v18 = vsel %vm46_vm0, %v78_v16, 0.0  ;;  %v96_v19 = vsel %vm46_vm0, %v94_v17, 0.0 }
 0x109   :  { %81 = vadd.xlane.f32.xlu0 %v80_v18 }
 0x10d   :  { %97 = vadd.xlane.f32.xlu0 %v96_v19 }
 0x13d   :  { %v49_v21 = vpop.xlane.xlu0 %48 }
 0x13e   :  { %v50_v22 = vmul.f32 0.5, %v49_v21 }
 0x140   :  { %v51_v26 = vsub.f32 40.0, %v50_v22 }
 0x142   :  { %v52_v30 = vmax.f32 %v51_v26, 0.0 }
 0x18e   :  { %v66_v23 = vpop.xlane.xlu1 %65 }
 0x18f   :  { %v67_v24 = vmul.f32 0.5, %v66_v23 }
 0x191   :  { %v68_v25 = vsub.f32 40.0, %v67_v24 }
 0x192   :  { %v82_v27 = vpop.xlane.xlu0 %81 }
 0x193   :  { %v83_v28 = vmul.f32 0.5, %v82_v27  ;;  %v69_v29 = vmax.f32 %v68_v25, 0.0 }
 0x195   :  { %v84_v31 = vsub.f32 40.0, %v83_v28  ;;  %v70_v35 = vadd.f32 %v69_v29, %v52_v30 }
 0x196   :  { %v98_v32 = vpop.xlane.xlu0 %97 }
 0x197   :  { %v85_v33 = vmax.f32 %v84_v31, 0.0  ;;  %v99_v34 = vmul.f32 0.5, %v98_v32 }
 0x199   :  { %v100_v36 = vsub.f32 40.0, %v99_v34  ;;  %v86_v37 = vadd.f32 %v85_v33, %v70_v35 }
 0x19b   :  { %v101_v38 = vmax.f32 %v100_v36, 0.0 }
 0x19d   :  { %v102_v40 = vadd.f32 %v101_v38, %v86_v37 }
 0x19f   :  { %v104_v41 = vadd.f32 %v103_v39, %v102_v40 }
 0x1a1   :  { %106 = vst.msk [vmem:[#allocation2] sm:$0xff] %vm40_vm1, %v104_v41 }
 0x1a8   :  { %v110_v42 = vld [vmem:[#allocation2] sm:$0xff] }
 0x1a9   :  { %v111_v43 = vsel %vm40_vm1, %v110_v42, 0.0 }
 0x1aa   :  { %112 = vadd.xlane.f32.xlu1 %v111_v43 }
 0x233   :  { %v113_v44 = vpop.xlane.xlu1 %112 }
 0x234   :  { %v114_v45 = vrot.slane %v113_v44, 4 }
 0x236   :  { %v115_v46 = vadd.f32 %v114_v45, %v113_v44 }
 0x238   :  { %v116_v47 = vrot.slane %v115_v46, 2 }
 0x23a   :  { %v117_v48 = vadd.f32 %v116_v47, %v115_v46 }
 0x23c   :  { %v118_v49 = vrot.slane %v117_v48, 1 }
 0x23e   :  { %v119_v50 = vadd.f32 %v118_v49, %v117_v48 }
 0x240   :  { %139 = vpush %v119_v50 }
 0x271   :  { %s140_s22 = spop %139 }
 0x272   :  { %v121_v51 = vstv %s140_s22 }
 0x273   :  { %122 = vst [vmem:[#allocation8] sm:$0x1] %v121_v51 }
 0x274   :  { %199 = shalt.err (!%p196_p0)
}
 0x275   :  { %132 = dma.vmem_to_hbm [thread:$0]  %s130_s21, 16, %s250_s2, [#allocation5]  }
 0x276   :  { %212 = dma.done.wait [#allocation5], 16  }
 0x277   :  { %213 = vsyncadd [#allocation5], 4294967280 }
 0x278   :  { %136 = vsyncpa [#allocation4], 1 }
 0x279   :  { %137 = vsyncpa [#allocation7], 1 }
 0x27a   :  { %138 = vsyncpa [#allocation5], 1 }

</bundles_post_ra>
